<compile_context>
chip_gen: v5e
topology: v5e:2x2
jax: 0.10.0
libtpu: 0.0.40
codegen_flags: <defaults>
</compile_context>

<pallas_src>
import jax
import jax.numpy as jnp
import numpy as np
from jax import lax
from jax.experimental import pallas as pl
from jax.experimental.pallas import tpu as pltpu


# ---------------------------------------------------------------------------
# Kernels
# ---------------------------------------------------------------------------

def _attentional_lr_mxu_kernel(x_ref, w_ref, b_ref, logits_ref, scores_ref):
    """MXU path (D < 128): x is lane-dense (TB, S*D); w is block-diag (S*D, 2S).

    x_ref:      (TB, S*D)  f32 VMEM   (read exactly once)
    w_ref:      (S*D, 2S)  f32 VMEM   cols [0:S] -> w_att, cols [S:2S] -> w_lr
    b_ref:      (2,)       f32 SMEM   [b_att, b_lr]
    logits_ref: (TB, 1)    f32 out
    scores_ref: (TB, S)    f32 out
    """
    S = scores_ref.shape[-1]
    x = x_ref[...]                                        # (TB, S*D)

    # One MXU matmul produces both per-timestep projections:
    #   p[b, s]     = x[b, s, :] . w_att
    #   p[b, S + s] = x[b, s, :] . w_lr
    p = jnp.dot(x, w_ref[...],
                preferred_element_type=jnp.float32,
                precision=lax.Precision.HIGHEST)          # (TB, 2S)
    att = p[:, :S] + b_ref[0]                             # (TB, S)
    proj = p[:, S:]                                       # (TB, S)

    # Softmax over the sequence (lane) axis; exact normalization for the scores.
    m = jnp.max(att, axis=-1, keepdims=True)
    e = jnp.exp(att - m)
    denom = jnp.sum(e, axis=-1, keepdims=True)
    score = e / denom                                     # (TB, S)

    # Fused pooling + final linear (by linearity of Linear_lr):
    #   Linear_lr(sum_s score_s * x_s) = sum_s score_s * (x_s . w_lr) + b_lr
    logits_ref[...] = (jnp.sum(score * proj, axis=-1, keepdims=True)
                       + b_ref[1]).astype(logits_ref.dtype)
    scores_ref[...] = score.astype(scores_ref.dtype)


def _attentional_lr_vpu_kernel(x_ref, w_ref, b_ref, logits_ref, scores_ref):
    """VPU fallback (D >= 128, or block-diag weight too large): x is (TB, S, D).

    x_ref:      (TB, S, D) f32 VMEM
    w_ref:      (2, D)     f32 VMEM   row 0 = w_att, row 1 = w_lr
    b_ref:      (2,)       f32 SMEM   [b_att, b_lr]
    """
    x = x_ref[...]                                        # (TB, S, D)
    att = jnp.sum(x * w_ref[0, :], axis=-1) + b_ref[0]    # (TB, S)
    proj = jnp.sum(x * w_ref[1, :], axis=-1)              # (TB, S)

    m = jnp.max(att, axis=-1, keepdims=True)
    e = jnp.exp(att - m)
    denom = jnp.sum(e, axis=-1, keepdims=True)
    score = e / denom

    logits_ref[...] = (jnp.sum(score * proj, axis=-1, keepdims=True)
                       + b_ref[1]).astype(logits_ref.dtype)
    scores_ref[...] = score.astype(scores_ref.dtype)


# ---------------------------------------------------------------------------
# Tiling policy (padding-aware, grid-step aware)
# ---------------------------------------------------------------------------

def _round_up(x, m):
    return ((x + m - 1) // m) * m


def _pick_batch_tile(B, padded_row_bytes):
    """Pick an 8-aligned batch tile sized against a ~2 MiB padded-VMEM target.

    Keeps the grid at >= 2 steps (>= 4 for larger batches) so v7x's second
    TensorCore gets work and BlockSpec double-buffering can overlap the x DMA
    with compute.  Tiny batches (B <= 8) run as a single full-batch tile
    (an 8-aligned tile is impossible there without violating the sublane rule).
    """
    if B <= 8:
        return B
    target_bytes = 2 * 1024 * 1024       # ~2 MiB tiles already reach ~85% of HBM BW
    tb = max(8, ((target_bytes // max(padded_row_bytes, 1)) // 8) * 8)
    min_steps = 4 if B >= 32 else 2
    step_cap = max(8, ((B // min_steps) // 8) * 8)
    tb = min(tb, step_cap, (B // 8) * 8)
    return max(8, tb)


_VMEM_LIMIT_BYTES = 32 * 1024 * 1024     # explicit: > v5e 16 MiB default, < v7x 64 MiB


# ---------------------------------------------------------------------------
# Wrapper
# ---------------------------------------------------------------------------

def mimic_attentional_lr_forward(inputs, w_att, b_att, w_lr, b_lr):
    """inputs: (B, S, D) f32; w_*: (1, D); b_*: (1, 1) (torch nn.Linear layout).

    Returns (logits (B,), endpoints={'attention_scores': (B, S, 1)}).
    """
    inputs = inputs.astype(jnp.float32)
    B, S, D = inputs.shape

    b2 = jnp.concatenate([jnp.reshape(b_att, (1,)),
                          jnp.reshape(b_lr, (1,))], axis=0).astype(jnp.float32)  # (2,)

    # Prefer the MXU/lane-dense path when D is lane-sparse (< 128) and the
    # block-diagonal weight stays small (it scales as S^2 * D).
    w_blk_padded_bytes = _round_up(S * D, 8) * _round_up(2 * S, 128) * 4
    use_mxu = (D < 128) and (w_blk_padded_bytes <= 4 * 1024 * 1024)

    compiler_params = pltpu.CompilerParams(
        dimension_semantics=("parallel",),            # megacore-split the batch (v7x)
        vmem_limit_bytes=_VMEM_LIMIT_BYTES,
    )

    if use_mxu:
        # Lane-dense view of x; contiguous dim-merge -> no data movement.
        x2 = jnp.reshape(inputs, (B, S * D))
        w_att_v = jnp.reshape(w_att, (D,)).astype(jnp.float32)
        w_lr_v = jnp.reshape(w_lr, (D,)).astype(jnp.float32)
        eye = jnp.eye(S, dtype=jnp.float32)
        # blk[s*D + d, t] = (s == t) * w[d]
        att_blk = (eye[:, None, :] * w_att_v[None, :, None]).reshape(S * D, S)
        lr_blk = (eye[:, None, :] * w_lr_v[None, :, None]).reshape(S * D, S)
        w_blk = jnp.concatenate([att_blk, lr_blk], axis=1)          # (S*D, 2S)

        padded_row_bytes = _round_up(S * D, 128) * 4                # lane-dense rows
        TB = _pick_batch_tile(B, padded_row_bytes)
        grid = (pl.cdiv(B, TB),)

        logits2d, scores = pl.pallas_call(
            _attentional_lr_mxu_kernel,
            out_shape=(
                jax.ShapeDtypeStruct((B, 1), jnp.float32),
                jax.ShapeDtypeStruct((B, S), jnp.float32),
            ),
            grid=grid,
            in_specs=[
                pl.BlockSpec((TB, S * D), lambda i: (i, 0)),        # x, batch-tiled
                pl.BlockSpec((S * D, 2 * S), lambda i: (0, 0)),     # resident weight
                pl.BlockSpec(memory_space=pltpu.MemorySpace.SMEM),  # scalar biases
            ],
            out_specs=(
                pl.BlockSpec((TB, 1), lambda i: (i, 0)),
                pl.BlockSpec((TB, S), lambda i: (i, 0)),
            ),
            compiler_params=compiler_params,
        )(x2, w_blk, b2)
    else:
        # VPU fallback: D already lane-dense (>= 128) or block-diag weight too big.
        w2 = jnp.concatenate([jnp.reshape(w_att, (1, D)),
                              jnp.reshape(w_lr, (1, D))], axis=0).astype(jnp.float32)

        padded_row_bytes = _round_up(S, 8) * _round_up(D, 128) * 4  # (S, D) tile padding
        TB = _pick_batch_tile(B, padded_row_bytes)
        grid = (pl.cdiv(B, TB),)

        logits2d, scores = pl.pallas_call(
            _attentional_lr_vpu_kernel,
            out_shape=(
                jax.ShapeDtypeStruct((B, 1), jnp.float32),
                jax.ShapeDtypeStruct((B, S), jnp.float32),
            ),
            grid=grid,
            in_specs=[
                pl.BlockSpec((TB, S, D), lambda i: (i, 0, 0)),
                pl.BlockSpec((2, D), lambda i: (0, 0)),
                pl.BlockSpec(memory_space=pltpu.MemorySpace.SMEM),
            ],
            out_specs=(
                pl.BlockSpec((TB, 1), lambda i: (i, 0)),
                pl.BlockSpec((TB, S), lambda i: (i, 0)),
            ),
            compiler_params=compiler_params,
        )(inputs, w2, b2)

    logits = logits2d[:, 0]                                # == .squeeze(1)
    endpoints = {"attention_scores": scores[:, :, None]}   # (B, S, 1)
    return logits, endpoints


# ---------------------------------------------------------------------------
# Pure-JAX reference (mirror of torch _attentional_lr_forward) and test
# ---------------------------------------------------------------------------

def _reference_forward(inputs, w_att, b_att, w_lr, b_lr):
    att = jnp.einsum("bsd,od->bso", inputs, w_att) + b_att[0]        # (B,S,1)
    score = jax.nn.softmax(att, axis=1)                              # (B,S,1)
    emb = jnp.sum(score * inputs, axis=1)                            # (B,D)
    logits = (jnp.einsum("bd,od->bo", emb, w_lr) + b_lr[0])[:, 0]
    return logits, score


def _run_and_check(B, S, D, seed=0):
    key = jax.random.PRNGKey(seed)
    k_x, k_wa, k_ba, k_wl, k_bl = jax.random.split(key, 5)

    inputs = jax.random.normal(k_x, (B, S, D), dtype=jnp.float32)
    bound = 1.0 / np.sqrt(D)
    w_att = jax.random.uniform(k_wa, (1, D), jnp.float32, -bound, bound)
    b_att = jax.random.uniform(k_ba, (1, 1), jnp.float32, -bound, bound)
    w_lr = jax.random.uniform(k_wl, (1, D), jnp.float32, -bound, bound)
    b_lr = jax.random.uniform(k_bl, (1, 1), jnp.float32, -bound, bound)

    logits, endpoints = mimic_attentional_lr_forward(inputs, w_att, b_att, w_lr, b_lr)
    logits = jax.block_until_ready(logits)
    scores = jax.block_until_ready(endpoints["attention_scores"])

    ref_logits, ref_scores = _reference_forward(inputs, w_att, b_att, w_lr, b_lr)
    # Logits tolerance covers the fused-pooling reduction-order change + MXU f32 path;
    # scores use an exact softmax divide so they track the reference tightly.
    np.testing.assert_allclose(np.asarray(logits), np.asarray(ref_logits),
                               rtol=2e-3, atol=2e-3)
    np.testing.assert_allclose(np.asarray(scores), np.asarray(ref_scores),
                               rtol=1e-3, atol=1e-3)
    assert logits.shape == (B,)
    assert scores.shape == (B, S, 1)


if __name__ == "__main__":
    # Toy shapes consistent with the module forward: (batch, sequence, input_size).
    _run_and_check(B=2, S=8, D=32, seed=0)
    # Larger batch exercising the multi-step parallel grid (TB=16, 4 grid steps).
    _run_and_check(B=64, S=8, D=32, seed=1)
    print("KERNEL_OK")
</pallas_src>

<mosaic_0001>
module attributes {stable_mosaic.version = 11 : i64} {
  func.func @_attentional_lr_mxu_kernel(%arg0: i32, %arg1: memref<2x256xf32, #tpu.memory_space<vmem>>, %arg2: memref<256x16xf32, #tpu.memory_space<vmem>>, %arg3: memref<2xf32, #tpu.memory_space<smem>>, %arg4: memref<2x1xf32, #tpu.memory_space<vmem>>, %arg5: memref<2x8xf32, #tpu.memory_space<vmem>>) attributes {dimension_semantics = [#tpu.dimension_semantics<parallel>], iteration_bounds = array<i64: 1>, scalar_prefetch = 0 : i64, scratch_operands = 0 : i64, tpu.core_type = #tpu.core_type<tc>, window_params = [{transform_indices = @transform_0, window_bounds = array<i64: 2, 256>}, {pipeline_mode = #tpu.pipeline_mode<synchronous>, transform_indices = @transform_1, window_bounds = array<i64: 256, 16>}, {transform_indices = @transform_2, window_bounds = array<i64: 2>}, {transform_indices = @transform_3, window_bounds = array<i64: 2, 1>}, {transform_indices = @transform_4, window_bounds = array<i64: 2, 8>}]} {
    %c0 = arith.constant 0 : index
    %c0_0 = arith.constant 0 : index
    %0 = vector.load %arg1[%c0, %c0_0] : memref<2x256xf32, #tpu.memory_space<vmem>>, vector<2x256xf32>
    %c0_1 = arith.constant 0 : index
    %c0_2 = arith.constant 0 : index
    %1 = vector.load %arg2[%c0_1, %c0_2] : memref<256x16xf32, #tpu.memory_space<vmem>>, vector<256x16xf32>
    %cst = arith.constant dense<0.000000e+00> : vector<2x16xf32>
    %2 = tpu.matmul %0, %1, %cst {dimension_numbers = #tpu.dot_dimension_numbers<[1], [0], [0], [1], [0, 0, 1, 1], [], []>, precision = #tpu.contract_precision<fp32>} : vector<2x256xf32>, vector<256x16xf32>, vector<2x16xf32> -> vector<2x16xf32>
    %3 = vector.extract_strided_slice %2 {offsets = [0, 0], sizes = [2, 8], strides = [1, 1]} : vector<2x16xf32> to vector<2x8xf32>
    %c0_3 = arith.constant 0 : index
    %4 = memref.load %arg3[%c0_3] : memref<2xf32, #tpu.memory_space<smem>>
    %5 = vector.broadcast %4 : f32 to vector<2x8xf32>
    %6 = arith.addf %3, %5 : vector<2x8xf32>
    %7 = vector.extract_strided_slice %2 {offsets = [0, 8], sizes = [2, 8], strides = [1, 1]} : vector<2x16xf32> to vector<2x8xf32>
    %cst_4 = arith.constant dense<0xFF800000> : vector<2xf32>
    %8 = vector.multi_reduction <maximumf>, %6, %cst_4 [1] : vector<2x8xf32> to vector<2xf32>
    %9 = vector.shape_cast %8 : vector<2xf32> to vector<2x1xf32>
    %10 = vector.broadcast %9 : vector<2x1xf32> to vector<2x8xf32>
    %11 = arith.subf %6, %10 : vector<2x8xf32>
    %12 = math.exp %11 : vector<2x8xf32>
    %cst_5 = arith.constant dense<0.000000e+00> : vector<2xf32>
    %13 = vector.multi_reduction <add>, %12, %cst_5 [1] : vector<2x8xf32> to vector<2xf32>
    %14 = vector.shape_cast %13 : vector<2xf32> to vector<2x1xf32>
    %15 = vector.broadcast %14 : vector<2x1xf32> to vector<2x8xf32>
    %16 = arith.divf %12, %15 : vector<2x8xf32>
    %17 = arith.mulf %16, %7 : vector<2x8xf32>
    %cst_6 = arith.constant dense<0.000000e+00> : vector<2xf32>
    %18 = vector.multi_reduction <add>, %17, %cst_6 [1] : vector<2x8xf32> to vector<2xf32>
    %19 = vector.shape_cast %18 : vector<2xf32> to vector<2x1xf32>
    %c1 = arith.constant 1 : index
    %20 = memref.load %arg3[%c1] : memref<2xf32, #tpu.memory_space<smem>>
    %21 = vector.broadcast %20 : f32 to vector<2x1xf32>
    %22 = arith.addf %19, %21 : vector<2x1xf32>
    %c0_7 = arith.constant 0 : index
    %c0_8 = arith.constant 0 : index
    %23 = vector.load %arg4[%c0_7, %c0_8] : memref<2x1xf32, #tpu.memory_space<vmem>>, vector<2x1xf32>
    tpu.vector_store %arg4[%c0_7, %c0_8], %22 {strides = array<i32>} : memref<2x1xf32, #tpu.memory_space<vmem>>, vector<2x1xf32>,
    %c0_9 = arith.constant 0 : index
    %c0_10 = arith.constant 0 : index
    %24 = vector.load %arg5[%c0_9, %c0_10] : memref<2x8xf32, #tpu.memory_space<vmem>>, vector<2x8xf32>
    tpu.vector_store %arg5[%c0_9, %c0_10], %16 {strides = array<i32>} : memref<2x8xf32, #tpu.memory_space<vmem>>, vector<2x8xf32>,
    return
  }
  func.func @transform_0(%arg0: i32) -> (i32, i32) {
    %c0_i32 = arith.constant 0 : i32
    %c0_i32_0 = arith.constant 0 : i32
    return %arg0, %c0_i32 : i32, i32
  }
  func.func @transform_1(%arg0: i32) -> (i32, i32) {
    %c0_i32 = arith.constant 0 : i32
    %c0_i32_0 = arith.constant 0 : i32
    %c0_i32_1 = arith.constant 0 : i32
    return %c0_i32, %c0_i32_0 : i32, i32
  }
  func.func @transform_2(%arg0: i32) -> i32 {
    %c0_i32 = arith.constant 0 : i32
    %c0_i32_0 = arith.constant 0 : i32
    return %c0_i32 : i32
  }
  func.func @transform_3(%arg0: i32) -> (i32, i32) {
    %c0_i32 = arith.constant 0 : i32
    %c0_i32_0 = arith.constant 0 : i32
    return %arg0, %c0_i32 : i32, i32
  }
  func.func @transform_4(%arg0: i32) -> (i32, i32) {
    %c0_i32 = arith.constant 0 : i32
    %c0_i32_0 = arith.constant 0 : i32
    return %arg0, %c0_i32 : i32, i32
  }
}

</mosaic_0001>

<bundles_post_ra>
// kernel: tpu_custom_call.1
= control target key start
LH: loop header
LB: loop body
LE: loop exit
PB: predicated region body
PF: predicated region fallthrough
CT: control target
= control target key end

     0   :  { %10 = vsyncpa [#allocation4], 0  ;;  %s1508_s0 = inlined_call_operand.vmem [shape: f32[2,256], index: 0, kind: input, shape index: {}]   ;;  %s1509_s1 = inlined_call_operand.vmem [shape: f32[256,16], index: 1, kind: input, shape index: {}]   ;;  %s1510_s2 = inlined_call_operand.vmem [shape: f32[2], index: 2, kind: input, shape index: {}]   ;;  %s1511_s3 = inlined_call_operand.vmem [shape: f32[2,1], index: 3, kind: output, shape index: {0}]   ;;  %s1512_s4 = inlined_call_operand.hbm [shape: f32[2,8], index: 4, kind: output, shape index: {1}]  }
   0x1   :  { %11 = vsyncpa [#allocation3], 0  ;;  %s21_s17 = sshll.u32 %s1510_s2, 4  ;;  %s862_s18 = smov [#allocation2]   ;;  %s22_s17 = int_to_ptr.vmem [resolvable:$true] %s21_s17 }
   0x2   :  { %24 = dma.vmem_to_smem %s22_s17, 16, %s862_s18, [#allocation4]  }
   0x3   :  { %858 = dma.done.wait [#allocation4], 16  }
   0x4   :  { %859 = vsyncadd [#allocation4], 4294967280 }
   0x5   :  { %29 = sfence }
   0x6   :  { %v46_v0 = vld [vmem:[%s1509_s1 + $0x78] sm:$0xff]  ;;  %v45_v1 = vld [vmem:[%s1509_s1 + $0x70] sm:$0xff]  ;;  %v44_v2 = vld [vmem:[%s1509_s1 + $0x68] sm:$0xff]  ;;  %vm754_vm0 = vcmask 58368   ;;  %s863_s28 = smov 120   ;;  %s864_s29 = smov [#allocation5]  }
   0x7   :  { %v902_v3 = vand.u32 4294901760, %v46_v0  ;;  %v904_v4 = vand.u32 4294901760, %v45_v1  ;;  %v906_v5 = vand.u32 4294901760, %v44_v2  ;;  %v43_v6 = vld [vmem:[%s1509_s1 + $0x60] sm:$0xff]  ;;  %v42_v7 = vld [vmem:[%s1509_s1 + $0x58] sm:$0xff]  ;;  %v41_v8 = vld [vmem:[%s1509_s1 + $0x50] sm:$0xff] }
   0x8   :  { %v917_v9 = vand.u32 4294901760, %v43_v6  ;;  %v919_v10 = vand.u32 4294901760, %v42_v7  ;;  %v921_v11 = vand.u32 4294901760, %v41_v8  ;;  %v40_v12 = vld [vmem:[%s1509_s1 + $0x48] sm:$0xff]  ;;  %v39_v13 = vld [vmem:[%s1509_s1 + $0x40] sm:$0xff]  ;;  %v38_v18 = vld [vmem:[%s1509_s1 + $0x38] sm:$0xff] }
   0x9   :  { %70 = vmatpush.msra.mxu0 %v902_v3  ;;  %v931_v14 = vsub.f32 %v46_v0, %v902_v3  ;;  %v934_v15 = vsub.f32 %v45_v1, %v904_v4  ;;  %266 = vmatpush.msra.mxu3 %v902_v3  ;;  %v938_v16 = vsub.f32 %v44_v2, %v906_v5  ;;  %v940_v17 = vand.u32 4294901760, %v40_v12  ;;  %v37_v26 = vld [vmem:[%s1509_s1 + $0x30] sm:$0xff]  ;;  %v36_v34 = vld [vmem:[%s1509_s1 + $0x28] sm:$0xff]  ;;  %v35_v42 = vld [vmem:[%s1509_s1 + $0x20] sm:$0xff]  ;;  %s800_s30 = sshll.u32 %s864_s29, 4  ;;  %s802_s7 = sshll.u32 %s1512_s4, 4  ;;  %s801_s30 = int_to_ptr.vmem [resolvable:$true] %s800_s30  ;;  %s803_s7 = int_to_ptr.hbm [resolvable:$true] %s802_s7 }
   0xa   :  { %v946_v19 = vsub.f32 %v43_v6, %v917_v9  ;;  %v949_v20 = vsub.f32 %v42_v7, %v919_v10  ;;  %v952_v21 = vsub.f32 %v41_v8, %v921_v11  ;;  %v959_v25 = vand.u32 4294901760, %v39_v13  ;;  %v34_v48 = vld [vmem:[%s1509_s1 + $0x18] sm:$0xff]  ;;  %v33_v54 = vld [vmem:[%s1509_s1 + $0x10] sm:$0xff]  ;;  %v30_v55 = vld [vmem:[%s1508_s0] sm:$0xf]  ;;  %s814_s8 = sld [smem:[#allocation2 + $0x1]] }
   0xb   :  { %72 = vmatpush.msra.mxu0 %v904_v4  ;;  %213 = vmatpush.msra.mxu2 %v931_v14  ;;  %v112_v22 = vand.u32 4294901760, %v931_v14  ;;  %v1528_v23 = vand.u32 4294901760, %v934_v15  ;;  %v1526_v24 = vand.u32 4294901760, %v938_v16  ;;  %v966_v28 = vand.u32 4294901760, %v38_v18  ;;  %v62_v60 = vld [vmem:[%s1509_s1 + $0xf8] sm:$0xff]  ;;  %v32_v62 = vld [vmem:[%s1509_s1 + $0x8] sm:$0xff] }
   0xc   :  { %268 = vmatpush.msra.mxu3 %v904_v4  ;;  %v1524_v27 = vand.u32 4294901760, %v946_v19  ;;  %v969_v29 = vsub.f32 %v40_v12, %v940_v17  ;;  %v1522_v33 = vand.u32 4294901760, %v949_v20  ;;  %v987_v35 = vand.u32 4294901760, %v37_v26  ;;  %64 = vst [vmem:[#allocation1] ss:$4 sm:$0xff] %v30_v55  ;;  %v31_v6 = vld [vmem:[%s1509_s1] sm:$0xff] }
   0xd   :  { %74 = vmatpush.msra.mxu0 %v906_v5  ;;  %216 = vmatpush.msra.mxu2 %v934_v15  ;;  %v113_v30 = vsub.f32 %v931_v14, %v112_v22  ;;  %v119_v31 = vsub.f32 %v934_v15, %v1528_v23  ;;  %v125_v32 = vsub.f32 %v938_v16, %v1526_v24  ;;  %v1521_v36 = vand.u32 4294901760, %v952_v21  ;;  %v61_v7 = vld [vmem:[%s1509_s1 + $0xf0] sm:$0xff] }
   0xe   :  { %270 = vmatpush.msra.mxu3 %v906_v5  ;;  %v131_v39 = vsub.f32 %v946_v19, %v1524_v27  ;;  %v996_v40 = vsub.f32 %v39_v13, %v959_v25  ;;  %v999_v41 = vand.u32 4294901760, %v36_v34  ;;  %v137_v44 = vsub.f32 %v949_v20, %v1522_v33 }
   0xf   :  { %76 = vmatpush.msra.mxu0 %v917_v9  ;;  %v114_v37 = vand.u32 4294901760, %v113_v30  ;;  %219 = vmatpush.msra.mxu2 %v938_v16  ;;  %v120_v38 = vand.u32 4294901760, %v119_v31  ;;  %v126_v43 = vand.u32 4294901760, %v125_v32  ;;  %v1519_v45 = vand.u32 4294901760, %v969_v29 }
  0x10   :  { %272 = vmatpush.msra.mxu3 %v917_v9  ;;  %v1010_v46 = vsub.f32 %v38_v18, %v966_v28  ;;  %v143_v47 = vsub.f32 %v952_v21, %v1521_v36  ;;  %v132_v49 = vand.u32 4294901760, %v131_v39  ;;  %v1021_v50 = vand.u32 4294901760, %v35_v42 }
  0x11   :  { %78 = vmatpush.msra.mxu0 %v919_v10  ;;  %115 = vmatpush.msra.mxu1 %v114_v37  ;;  %v1518_v51 = vand.u32 4294901760, %v996_v40  ;;  %v1025_v52 = vsub.f32 %v37_v26, %v987_v35  ;;  %v1030_v53 = vsub.f32 %v36_v34, %v999_v41  ;;  %v138_v56 = vand.u32 4294901760, %v137_v44  ;;  %v60_v34 = vld [vmem:[%s1509_s1 + $0xe8] sm:$0xff] }
  0x12   :  { %222 = vmatpush.msra.mxu2 %v946_v19  ;;  %274 = vmatpush.msra.mxu3 %v919_v10  ;;  %v149_v57 = vsub.f32 %v969_v29, %v1519_v45  ;;  %v1042_v58 = vand.u32 4294901760, %v34_v48  ;;  %v1517_v59 = vand.u32 4294901760, %v1010_v46  ;;  %v144_v61 = vand.u32 4294901760, %v143_v47  ;;  %v59_v47 = vld [vmem:[%s1509_s1 + $0xe0] sm:$0xff] }
  0x13   :  { %80 = vmatpush.msra.mxu0 %v921_v11  ;;  %121 = vmatpush.msra.mxu1 %v120_v38  ;;  %v155_v63 = vsub.f32 %v996_v40, %v1518_v51  ;;  %v1057_v0 = vand.u32 4294901760, %v33_v54  ;;  %v1515_v1 = vand.u32 4294901760, %v1025_v52  ;;  %v1061_v2 = vsub.f32 %v35_v42, %v1021_v50  ;;  %v55_v45 = vld [vmem:[%s1509_s1 + $0xc0] sm:$0xff] }
  0x14   :  { %225 = vmatpush.msra.mxu2 %v949_v20  ;;  %276 = vmatpush.msra.mxu3 %v921_v11  ;;  %v1514_v8 = vand.u32 4294901760, %v1030_v53  ;;  %v1072_v12 = vand.u32 4294901760, %v62_v60  ;;  %v150_v13 = vand.u32 4294901760, %v149_v57  ;;  %v161_v18 = vsub.f32 %v1010_v46, %v1517_v59 }
  0x15   :  { %82 = vmatpush.msra.mxu0 %v940_v17  ;;  %127 = vmatpush.msra.mxu1 %v126_v43  ;;  %v1078_v26 = vand.u32 4294901760, %v32_v62  ;;  %v1081_v30 = vsub.f32 %v34_v48, %v1042_v58  ;;  %v1085_v31 = vand.u32 4294901760, %v31_v6  ;;  %v1087_v32 = vand.u32 4294901760, %v61_v7 }
  0x16   :  { %228 = vmatpush.msra.mxu2 %v952_v21  ;;  %278 = vmatpush.msra.mxu3 %v940_v17  ;;  %v156_v37 = vand.u32 4294901760, %v155_v63  ;;  %v167_v38 = vsub.f32 %v1025_v52, %v1515_v1  ;;  %v1513_v39 = vand.u32 4294901760, %v1061_v2  ;;  %v1098_v42 = vsub.f32 %v33_v54, %v1057_v0 }
  0x17   :  { %84 = vmatpush.msra.mxu0 %v959_v25  ;;  %133 = vmatpush.msra.mxu1 %v132_v49  ;;  %v173_v43 = vsub.f32 %v1030_v53, %v1514_v8  ;;  %v1106_v44 = vsub.f32 %v62_v60, %v1072_v12  ;;  %v162_v48 = vand.u32 4294901760, %v161_v18  ;;  %v1516_v49 = vand.u32 4294901760, %v1081_v30  ;;  %v58_v60 = vld [vmem:[%s1509_s1 + $0xd8] sm:$0xff]  ;;  %v57_v18 = vld [vmem:[%s1509_s1 + $0xd0] sm:$0xff]  ;;  %v56_v8 = vld [vmem:[%s1509_s1 + $0xc8] sm:$0xff] }
  0x18   :  { %231 = vmatpush.msra.mxu2 %v969_v29  ;;  %280 = vmatpush.msra.mxu3 %v959_v25  ;;  %v1114_v54 = vsub.f32 %v32_v62, %v1078_v26  ;;  %v1116_v55 = vand.u32 4294901760, %v60_v34  ;;  %v1124_v57 = vsub.f32 %v61_v7, %v1087_v32  ;;  %v179_v62 = vsub.f32 %v1061_v2, %v1513_v39 }
  0x19   :  { %86 = vmatpush.msra.mxu0 %v966_v28  ;;  %139 = vmatpush.msra.mxu1 %v138_v56  ;;  %v1121_v56 = vsub.f32 %v31_v6, %v1085_v31  ;;  %v1520_v63 = vand.u32 4294901760, %v1098_v42  ;;  %v174_v6 = vand.u32 4294901760, %v173_v43  ;;  %v1523_v7 = vand.u32 4294901760, %v1106_v44 }
  0x1a   :  { %234 = vmatpush.msra.mxu2 %v996_v40  ;;  %282 = vmatpush.msra.mxu3 %v966_v28  ;;  %1537 = vst [vmem:[#allocation8_spill] sm:$0xff] %v1116_v55  ;;  %v1148_v39 = vsub.f32 %v60_v34, %v1116_v55  ;;  %v1150_v43 = vand.u32 4294901760, %v58_v60  ;;  %v1527_v1 = vand.u32 4294901760, %v1124_v57  ;;  %v1166_v51 = vand.u32 4294901760, %v57_v18 }
  0x1b   :  { %88 = vmatpush.msra.mxu0 %v987_v35  ;;  %145 = vmatpush.msra.mxu1 %v144_v61  ;;  %v168_v61 = vand.u32 4294901760, %v167_v38  ;;  %v1525_v38 = vand.u32 4294901760, %v1114_v54  ;;  %v191_v34 = vsub.f32 %v1098_v42, %v1520_v63  ;;  %v1191_v27 = vand.u32 4294901760, %v55_v45 }
  0x1c   :  { %237 = vmatpush.msra.mxu2 %v1010_v46  ;;  %284 = vmatpush.msra.mxu3 %v987_v35  ;;  %v1530_v36 = vand.u32 4294901760, %v1148_v39  ;;  %v1184_v33 = vsub.f32 %v58_v60, %v1150_v43  ;;  %v1202_v24 = vsub.f32 %v57_v18, %v1166_v51  ;;  %vm790_vm5 = vcmask 1024  }
  0x1d   :  { %90 = vmatpush.msra.mxu0 %v999_v41  ;;  %151 = vmatpush.msra.mxu1 %v150_v13  ;;  %v1134_v13 = vand.u32 4294901760, %v59_v47  ;;  %v197_v63 = vsub.f32 %v1114_v54, %v1525_v38 }
  0x1e   :  { %240 = vmatpush.msra.mxu2 %v1025_v52  ;;  %286 = vmatpush.msra.mxu3 %v999_v41  ;;  %v466_v18 = vsub.f32 %v1148_v39, %v1530_v36  ;;  %v1532_v14 = vand.u32 4294901760, %v1184_v33 }
  0x1f   :  { %92 = vmatpush.msra.mxu0 %v1021_v50  ;;  %157 = vmatpush.msra.mxu1 %v156_v37  ;;  %v185_v37 = vsub.f32 %v1081_v30, %v1516_v49  ;;  %v180_v49 = vand.u32 4294901760, %v179_v62  ;;  %v1164_v59 = vsub.f32 %v59_v47, %v1134_v13  ;;  %v1176_v62 = vand.u32 4294901760, %v56_v8 }
  0x20   :  { %243 = vmatpush.msra.mxu2 %v1030_v53  ;;  %288 = vmatpush.msra.mxu3 %v1021_v50 }
  0x21   :  { %94 = vmatpush.msra.mxu0 %v1042_v58  ;;  %163 = vmatpush.msra.mxu1 %v162_v48  ;;  %v1529_v48 = vand.u32 4294901760, %v1121_v56  ;;  %v186_v47 = vand.u32 4294901760, %v185_v37  ;;  %v192_v37 = vand.u32 4294901760, %v191_v34  ;;  %v1531_v38 = vand.u32 4294901760, %v1164_v59 }
  0x22   :  { %246 = vmatpush.msra.mxu2 %v1061_v2  ;;  %290 = vmatpush.msra.mxu3 %v1042_v58  ;;  %v1208_v23 = vsub.f32 %v56_v8, %v1176_v62  ;;  %v198_v34 = vand.u32 4294901760, %v197_v63  ;;  %v52_v63 = vld [vmem:[%s1509_s1 + $0xa8] sm:$0xff] }
  0x23   :  { %96 = vmatpush.msra.mxu0 %v1057_v0  ;;  %169 = vmatpush.msra.mxu1 %v168_v61  ;;  %v454_v61 = vsub.f32 %v1106_v44, %v1523_v7  ;;  %v460_v7 = vsub.f32 %v1124_v57, %v1527_v1  ;;  %v203_v60 = vsub.f32 %v1121_v56, %v1529_v48 }
  0x24   :  { %249 = vmatpush.msra.mxu2 %v1081_v30  ;;  %292 = vmatpush.msra.mxu3 %v1057_v0  ;;  %v1224_v48 = vsub.f32 %v55_v45, %v1191_v27  ;;  %v472_v36 = vsub.f32 %v1164_v59, %v1531_v38  ;;  %v478_v38 = vsub.f32 %v1184_v33, %v1532_v14  ;;  %v1541_v14 = vand.u32 4294901760, %v1202_v24 }
  0x25   :  { %98 = vmatpush.msra.mxu0 %v1078_v26  ;;  %175 = vmatpush.msra.mxu1 %v174_v6  ;;  %v54_v6 = vld [vmem:[%s1509_s1 + $0xb8] sm:$0xff]  ;;  %v455_v1 = vand.u32 4294901760, %v454_v61  ;;  %v1538_v61 = vand.u32 4294901760, %v934_v15  ;;  %v461_v8 = vand.u32 4294901760, %v460_v7  ;;  %v1539_v7 = vand.u32 4294901760, %v938_v16 }
  0x26   :  { %252 = vmatpush.msra.mxu2 %v1098_v42  ;;  %294 = vmatpush.msra.mxu3 %v1078_v26  ;;  %v1249_v16 = vand.u32 4294901760, %v52_v63 }
  0x27   :  { %100 = vmatpush.msra.mxu0 %v1085_v31  ;;  %181 = vmatpush.msra.mxu1 %v180_v49  ;;  %v53_v49 = vld [vmem:[%s1509_s1 + $0xb0] sm:$0xff] }
  0x28   :  { %255 = vmatpush.msra.mxu2 %v1114_v54  ;;  %296 = vmatpush.msra.mxu3 %v1085_v31 }
  0x29   :  { %307 = vmatpush.msrb.mxu0 %v112_v22  ;;  %187 = vmatpush.msra.mxu1 %v186_v47  ;;  %v1218_v22 = vand.u32 4294901760, %v54_v6  ;;  %v204_v47 = vand.u32 4294901760, %v203_v60  ;;  %v467_v60 = vand.u32 4294901760, %v466_v18  ;;  %v473_v18 = vand.u32 4294901760, %v472_v36 }
  0x2a   :  { %258 = vmatpush.msra.mxu2 %v1121_v56  ;;  %456 = vmatpush.msrb.mxu3 %v455_v1  ;;  %v1540_v1 = vand.u32 4294901760, %v946_v19  ;;  %v479_v36 = vand.u32 4294901760, %v478_v38  ;;  %v49_v38 = vld [vmem:[%s1509_s1 + $0x90] sm:$0xff] }
  0x2b   :  { %311 = vmatpush.msrb.mxu0 %v1538_v61  ;;  %193 = vmatpush.msra.mxu1 %v192_v37  ;;  %v1234_v61 = vand.u32 4294901760, %v53_v49  ;;  %v51_v37 = vld [vmem:[%s1509_s1 + $0xa0] sm:$0xff]  ;;  %v1247_v15 = vsub.f32 %v54_v6, %v1218_v22  ;;  %v484_v6 = vsub.f32 %v1202_v24, %v1541_v14 }
  0x2c   :  { %411 = vmatpush.msrb.mxu2 %v1072_v12  ;;  %462 = vmatpush.msrb.mxu3 %v461_v8  ;;  %v1264_v19 = vand.u32 4294901760, %v51_v37  ;;  %v1542_v8 = vand.u32 4294901760, %v949_v20  ;;  %v1544_v20 = vand.u32 4294901760, %v952_v21 }
  0x2d   :  { %315 = vmatpush.msrb.mxu0 %v1539_v7  ;;  %199 = vmatpush.msra.mxu1 %v198_v34  ;;  %v50_v34 = vld [vmem:[%s1509_s1 + $0x98] sm:$0xff]  ;;  %v1262_v45 = vsub.f32 %v53_v49, %v1234_v61  ;;  %v65_v7 = vld.sshfl [vmem:[#allocation1] sm:$0xff pattern:$0x73625140]  ;;  %v1535_v14 = vand.u32 4294901760, %v1247_v15  ;;  %v1275_v49 = vsub.f32 %v52_v63, %v1249_v16  ;;  %v485_v63 = vand.u32 4294901760, %v484_v6 }
  0x2e   :  { %413 = vmatpush.msrb.mxu2 %v1087_v32  ;;  %468 = vmatpush.msrb.mxu3 %v467_v60  ;;  %v1293_v21 = vand.u32 4294901760, %v65_v7  ;;  %v1306_v6 = vand.u32 4294901760, %v49_v38 }
  0x2f   :  { %319 = vmatpush.msrb.mxu0 %v1540_v1  ;;  %205 = vmatpush.msra.mxu1 %v204_v47  ;;  %v1543_v1 = vand.u32 4294901760, %v1208_v23  ;;  %v1536_v60 = vand.u32 4294901760, %v1262_v45 }
  0x30   :  { %415 = vmatpush.msrb.mxu2 %v1116_v55  ;;  %v1277_v55 = vand.u32 4294901760, %v50_v34  ;;  %474 = vmatpush.msrb.mxu3 %v473_v18  ;;  %v513_v18 = vand.u32 4294901760, %v1275_v49 }
  0x31   :  { %323 = vmatpush.msrb.mxu0 %v1542_v8  ;;  %374 = vmatpush.msrb.mxu1 %v902_v3  ;;  %v490_v47 = vsub.f32 %v1208_v23, %v1543_v1  ;;  %v1545_v3 = vand.u32 4294901760, %v1224_v48  ;;  %v1291_v1 = vsub.f32 %v51_v37, %v1264_v19  ;;  %v502_v37 = vsub.f32 %v1247_v15, %v1535_v14 }
  0x32   :  { %417 = vmatpush.msrb.mxu2 %v1134_v13  ;;  %480 = vmatpush.msrb.mxu3 %v479_v36  ;;  %v508_v36 = vsub.f32 %v1262_v45, %v1536_v60  ;;  %v1320_v14 = vsub.f32 %v65_v7, %v1293_v21  ;;  %v514_v7 = vsub.f32 %v1275_v49, %v513_v18  ;;  %v1549_v60 = vand.u32 4294901760, %v1025_v52 }
  0x33   :  { %327 = vmatpush.msrb.mxu0 %v1544_v20  ;;  %376 = vmatpush.msrb.mxu1 %v904_v4  ;;  %v496_v8 = vsub.f32 %v1224_v48, %v1545_v3  ;;  %v1546_v4 = vand.u32 4294901760, %v969_v29  ;;  %v491_v20 = vand.u32 4294901760, %v490_v47  ;;  %v48_v3 = vld [vmem:[%s1509_s1 + $0x88] sm:$0xff]  ;;  %v1309_v29 = vsub.f32 %v50_v34, %v1277_v55 }
  0x34   :  { %419 = vmatpush.msrb.mxu2 %v1150_v43  ;;  %486 = vmatpush.msrb.mxu3 %v485_v63  ;;  %v1322_v34 = vand.u32 4294901760, %v48_v3  ;;  %v1550_v52 = vand.u32 4294901760, %v1030_v53 }
  0x35   :  { %331 = vmatpush.msrb.mxu0 %v1546_v4  ;;  %378 = vmatpush.msrb.mxu1 %v906_v5  ;;  %v1547_v5 = vand.u32 4294901760, %v996_v40  ;;  %v497_v47 = vand.u32 4294901760, %v496_v8  ;;  %v519_v4 = vand.u32 4294901760, %v1291_v1  ;;  %v47_v40 = vld [vmem:[%s1509_s1 + $0x80] sm:$0xff]  ;;  %v503_v8 = vand.u32 4294901760, %v502_v37  ;;  %s751_s1 = sld [smem:[#allocation2]] }
  0x36   :  { %421 = vmatpush.msrb.mxu2 %v1166_v51  ;;  %492 = vmatpush.msrb.mxu3 %v491_v20  ;;  %v525_v63 = vand.u32 4294901760, %v1309_v29  ;;  %v103_v37 = vand.u32 4294901760, %v1320_v14 }
  0x37   :  { %335 = vmatpush.msrb.mxu0 %v1547_v5  ;;  %380 = vmatpush.msrb.mxu1 %v917_v9  ;;  %v1548_v9 = vand.u32 4294901760, %v1010_v46  ;;  %v1336_v5 = vsub.f32 %v49_v38, %v1306_v6  ;;  %v1341_v46 = vand.u32 4294901760, %v47_v40  ;;  %v520_v20 = vsub.f32 %v1291_v1, %v519_v4 }
  0x38   :  { %423 = vmatpush.msrb.mxu2 %v1176_v62  ;;  %498 = vmatpush.msrb.mxu3 %v497_v47  ;;  %v1349_v38 = vsub.f32 %v48_v3, %v1322_v34  ;;  %v526_v47 = vsub.f32 %v1309_v29, %v525_v63  ;;  %v104_v3 = vsub.f32 %v1320_v14, %v103_v37 }
  0x39   :  { %339 = vmatpush.msrb.mxu0 %v1548_v9  ;;  %382 = vmatpush.msrb.mxu1 %v919_v10  ;;  %v509_v10 = vand.u32 4294901760, %v508_v36  ;;  %v531_v36 = vand.u32 4294901760, %v1336_v5  ;;  %v1551_v9 = vand.u32 4294901760, %v1061_v2  ;;  %v1363_v53 = vsub.f32 %v47_v40, %v1341_v46 }
  0x3a   :  { %425 = vmatpush.msrb.mxu2 %v1191_v27  ;;  %504 = vmatpush.msrb.mxu3 %v503_v8  ;;  %v537_v8 = vand.u32 4294901760, %v1349_v38  ;;  %v1553_v40 = vand.u32 4294901760, %v1098_v42  ;;  %v1555_v42 = vand.u32 4294901760, %v1121_v56 }
  0x3b   :  { %343 = vmatpush.msrb.mxu0 %v1549_v60  ;;  %384 = vmatpush.msrb.mxu1 %v921_v11  ;;  %v66_v11 = vld.sshfl [vmem:[#allocation1 + $0x8] sm:$0xff pattern:$0x73625140]  ;;  %v515_v60 = vand.u32 4294901760, %v514_v7  ;;  %v532_v2 = vsub.f32 %v1336_v5, %v531_v36 }
  0x3c   :  { %427 = vmatpush.msrb.mxu2 %v1218_v22  ;;  %510 = vmatpush.msrb.mxu3 %v509_v10  ;;  %v1368_v7 = vand.u32 4294901760, %v66_v11  ;;  %v543_v10 = vand.u32 4294901760, %v1363_v53 }
  0x3d   :  { %347 = vmatpush.msrb.mxu0 %v1550_v52  ;;  %386 = vmatpush.msrb.mxu1 %v940_v17  ;;  %v521_v17 = vand.u32 4294901760, %v520_v20  ;;  %v1552_v52 = vand.u32 4294901760, %v1081_v30  ;;  %v105_v30 = vand.u32 4294901760, %v104_v3 }
  0x3e   :  { %429 = vmatpush.msrb.mxu2 %v1234_v61  ;;  %516 = vmatpush.msrb.mxu3 %v515_v60  ;;  %v1386_v20 = vsub.f32 %v66_v11, %v1368_v7  ;;  %v1554_v60 = vand.u32 4294901760, %v1114_v54 }
  0x3f   :  { %351 = vmatpush.msrb.mxu0 %v1551_v9  ;;  %388 = vmatpush.msrb.mxu1 %v959_v25  ;;  %v527_v25 = vand.u32 4294901760, %v526_v47  ;;  %v544_v47 = vsub.f32 %v1363_v53, %v543_v10 }
  0x40   :  { %431 = vmatpush.msrb.mxu2 %v1249_v16  ;;  %522 = vmatpush.msrb.mxu3 %v521_v17  ;;  %v444_v11 = vand.u32 4294901760, %v1386_v20 }
  0x41   :  { %355 = vmatpush.msrb.mxu0 %v1552_v52  ;;  %390 = vmatpush.msrb.mxu1 %v966_v28  ;;  %v538_v28 = vsub.f32 %v1349_v38, %v537_v8 }
  0x42   :  { %433 = vmatpush.msrb.mxu2 %v1264_v19  ;;  %528 = vmatpush.msrb.mxu3 %v527_v25 }
  0x43   :  { %359 = vmatpush.msrb.mxu0 %v1553_v40  ;;  %392 = vmatpush.msrb.mxu1 %v987_v35  ;;  %v533_v35 = vand.u32 4294901760, %v532_v2  ;;  %v539_v54 = vand.u32 4294901760, %v538_v28 }
  0x44   :  { %435 = vmatpush.msrb.mxu2 %v1277_v55  ;;  %106 = vmatmul.f32.vlgmr.msra.gmra.mxu0 %v105_v30 }
  0x45   :  { %363 = vmatpush.msrb.mxu0 %v1554_v60  ;;  %394 = vmatpush.msrb.mxu1 %v999_v41  ;;  %v545_v41 = vand.u32 4294901760, %v544_v47 }
  0x46   :  { %437 = vmatpush.msrb.mxu2 %v1306_v6  ;;  %534 = vmatpush.msrb.mxu3 %v533_v35 }
  0x47   :  { %367 = vmatpush.msrb.mxu0 %v1555_v42  ;;  %396 = vmatpush.msrb.mxu1 %v1021_v50  ;;  %v445_v50 = vsub.f32 %v1386_v20, %v444_v11  ;;  %v788_v42 = vstv %s814_s8 }
  0x48   :  { %439 = vmatpush.msrb.mxu2 %v1322_v34  ;;  %540 = vmatpush.msrb.mxu3 %v539_v54 }
  0x49   :  { %554 = vmatpush.msra.mxu0 %v1106_v44  ;;  %398 = vmatpush.msrb.mxu1 %v1042_v58  ;;  %v1556_v58 = vand.u32 4294901760, %v1106_v44  ;;  %v446_v56 = vand.u32 4294901760, %v445_v50  ;;  %v1558_v44 = vand.u32 4294901760, %v1148_v39 }
  0x4a   :  { %261 = vmatmul.f32.vlgmr.msra.gmra.mxu2 %v1320_v14  ;;  %300 = vmatmul.f32.vlgmr.msra.gmra.mxu3 %v103_v37 }
  0x4b   :  { %557 = vmatpush.msra.mxu0 %v1124_v57  ;;  %400 = vmatpush.msrb.mxu1 %v1057_v0  ;;  %v1557_v0 = vand.u32 4294901760, %v1124_v57  ;;  %v1560_v57 = vld [vmem:[#allocation8_spill] sm:$0xff] }
  0x4c   :  { %441 = vmatpush.msrb.mxu2 %v1341_v46  ;;  %546 = vmatpush.msrb.mxu3 %v545_v41 }
  0x4d   :  { %560 = vmatpush.msra.mxu0 %v1148_v39  ;;  %402 = vmatpush.msrb.mxu1 %v1078_v26  ;;  %v1559_v26 = vand.u32 4294901760, %v1164_v59 }
  0x4e   :  { %648 = vmatpush.msra.mxu2 %v1556_v58  ;;  %207 = vmatmul.f32.vlgmr.msra.gmra.mxu1 %v1293_v21 }
  0x4f   :  { %563 = vmatpush.msra.mxu0 %v1164_v59  ;;  %715 = vmatpush.msra.mxu3 %v1072_v12  ;;  %v1562_v59 = vand.u32 4294901760, %v1202_v24 }
  0x50   :  { %652 = vmatpush.msra.mxu2 %v1557_v0  ;;  %404 = vmatpush.msrb.mxu1 %v1085_v31  ;;  %v1564_v31 = vand.u32 4294901760, %v1224_v48 }
  0x51   :  { %566 = vmatpush.msra.mxu0 %v1184_v33  ;;  %717 = vmatpush.msra.mxu3 %v1087_v32 }
  0x52   :  { %607 = vmatpush.msra.mxu1 %v1072_v12  ;;  %656 = vmatpush.msra.mxu2 %v1558_v44  ;;  %v1561_v12 = vand.u32 4294901760, %v1184_v33  ;;  %v1563_v33 = vand.u32 4294901760, %v1208_v23 }
  0x53   :  { %447 = vmatmul.f32.vlgmr.msrb.gmra.mxu2 %v446_v56  ;;  %569 = vmatpush.msra.mxu0 %v1202_v24  ;;  %v1565_v24 = vand.u32 4294901760, %v1247_v15 }
  0x54   :  { %609 = vmatpush.msra.mxu1 %v1087_v32  ;;  %660 = vmatpush.msra.mxu2 %v1559_v26 }
  0x55   :  { %719 = vmatpush.msra.mxu3 %v1560_v57  ;;  %369 = vmatmul.f32.vlgmr.msrb.gmra.mxu0 %v1293_v21 }
  0x56   :  { %548 = vmatmul.f32.vlgmr.msrb.gmra.mxu3 %v1368_v7  ;;  %572 = vmatpush.msra.mxu0 %v1208_v23  ;;  %v1566_v23 = vand.u32 4294901760, %v1262_v45 }
  0x57   :  { %611 = vmatpush.msra.mxu1 %v1560_v57  ;;  %664 = vmatpush.msra.mxu2 %v1561_v12 }
  0x58   :  { %721 = vmatpush.msra.mxu3 %v1134_v13  ;;  %406 = vmatmul.f32.vlgmr.msrb.gmra.mxu1 %v1293_v21 }
  0x59   :  { %575 = vmatpush.msra.mxu0 %v1224_v48  ;;  %613 = vmatpush.msra.mxu1 %v1134_v13 }
  0x5a   :  { %668 = vmatpush.msra.mxu2 %v1562_v59  ;;  %723 = vmatpush.msra.mxu3 %v1150_v43 }
  0x5b   :  { %578 = vmatpush.msra.mxu0 %v1247_v15  ;;  %615 = vmatpush.msra.mxu1 %v1150_v43 }
  0x5c   :  { %672 = vmatpush.msra.mxu2 %v1563_v33  ;;  %725 = vmatpush.msra.mxu3 %v1166_v51 }
  0x5d   :  { %581 = vmatpush.msra.mxu0 %v1262_v45  ;;  %617 = vmatpush.msra.mxu1 %v1166_v51 }
  0x5e   :  { %676 = vmatpush.msra.mxu2 %v1564_v31  ;;  %727 = vmatpush.msra.mxu3 %v1176_v62 }
  0x5f   :  { %584 = vmatpush.msra.mxu0 %v1275_v49  ;;  %619 = vmatpush.msra.mxu1 %v1176_v62 }
  0x60   :  { %680 = vmatpush.msra.mxu2 %v1565_v24  ;;  %729 = vmatpush.msra.mxu3 %v1191_v27 }
  0x61   :  { %587 = vmatpush.msra.mxu0 %v1291_v1  ;;  %621 = vmatpush.msra.mxu1 %v1191_v27 }
  0x62   :  { %684 = vmatpush.msra.mxu2 %v1566_v23  ;;  %731 = vmatpush.msra.mxu3 %v1218_v22 }
  0x63   :  { %590 = vmatpush.msra.mxu0 %v1309_v29  ;;  %623 = vmatpush.msra.mxu1 %v1218_v22 }
  0x64   :  { %688 = vmatpush.msra.mxu2 %v513_v18  ;;  %733 = vmatpush.msra.mxu3 %v1234_v61 }
  0x65   :  { %593 = vmatpush.msra.mxu0 %v1336_v5  ;;  %625 = vmatpush.msra.mxu1 %v1234_v61 }
  0x66   :  { %692 = vmatpush.msra.mxu2 %v519_v4  ;;  %735 = vmatpush.msra.mxu3 %v1249_v16  ;;  %v752_v4 = vstv %s751_s1 }
  0x67   :  { %596 = vmatpush.msra.mxu0 %v1349_v38  ;;  %627 = vmatpush.msra.mxu1 %v1249_v16 }
  0x68   :  { %696 = vmatpush.msra.mxu2 %v525_v63  ;;  %737 = vmatpush.msra.mxu3 %v1264_v19 }
  0x69   :  { %599 = vmatpush.msra.mxu0 %v1363_v53  ;;  %629 = vmatpush.msra.mxu1 %v1264_v19 }
  0x6a   :  { %700 = vmatpush.msra.mxu2 %v531_v36  ;;  %739 = vmatpush.msra.mxu3 %v1277_v55 }
  0x6b   :  { %602 = vmatmul.f32.vlgmr.msra.gmra.mxu0 %v1386_v20  ;;  %631 = vmatpush.msra.mxu1 %v1277_v55 }
  0x6c   :  { %704 = vmatpush.msra.mxu2 %v537_v8  ;;  %741 = vmatpush.msra.mxu3 %v1306_v6 }
  0x6d   :  { %633 = vmatpush.msra.mxu1 %v1306_v6 }
  0x6e   :  { %708 = vmatpush.msra.mxu2 %v543_v10  ;;  %743 = vmatpush.msra.mxu3 %v1322_v34 }
  0x6f   :  { %710 = vmatmul.f32.vlgmr.msra.gmra.mxu2 %v1368_v7  ;;  %635 = vmatpush.msra.mxu1 %v1322_v34 }
  0x70   :  { %745 = vmatpush.msra.mxu3 %v1341_v46 }
  0x71   :  { %747 = vmatmul.f32.vlgmr.msra.gmra.mxu3 %v1368_v7  ;;  %637 = vmatpush.msra.mxu1 %v1341_v46 }
  0x72   :  { %641 = vmatmul.f32.vlgmr.msra.gmra.mxu1 %v444_v11 }
  0xc1   :  { %v107_v51 = vpop.f32.mrf.mxu0 }
  0xcb   :  { %v208_v27 = vpop.f32.mrf.mxu1 }
  0xcc   :  { %v209_v32 = vadd.f32 %v208_v27, %v107_v51 }
  0xcd   :  { %v262_v39 = vpop.f32.mrf.mxu2  ;;  %v301_v13 = vpop.f32.mrf.mxu3 }
  0xce   :  { %v263_v55 = vadd.f32 %v262_v39, %v209_v32 }
  0xd0   :  { %v302_v43 = vadd.f32 %v301_v13, %v263_v55 }
  0xd2   :  { %v370_v48 = vpop.f32.mrf.mxu0 }
  0xd3   :  { %v371_v62 = vadd.f32 %v370_v48, %v302_v43 }
  0xd5   :  { %v407_v22 = vpop.f32.mrf.mxu1 }
  0xd6   :  { %v408_v15 = vadd.f32 %v407_v22, %v371_v62  ;;  %v448_v61 = vpop.f32.mrf.mxu2 }
  0xd8   :  { %v449_v45 = vadd.f32 %v448_v61, %v408_v15 }
  0xd9   :  { %v549_v16 = vpop.f32.mrf.mxu3 }
  0xda   :  { %v550_v14 = vadd.f32 %v549_v16, %v449_v45 }
  0xe8   :  { %v603_v19 = vpop.f32.mrf.mxu0 }
  0xe9   :  { %v604_v49 = vadd.f32 %v603_v19, %v550_v14 }
  0xef   :  { %v642_v1 = vpop.f32.mrf.mxu1 }
  0xf0   :  { %v643_v21 = vadd.f32 %v642_v1, %v604_v49 }
  0xf2   :  { %v711_v18 = vpop.f32.mrf.mxu2 }
  0xf3   :  { %v712_v6 = vadd.f32 %v711_v18, %v643_v21 }
  0xf4   :  { %v748_v29 = vpop.f32.mrf.mxu3 }
  0xf5   :  { %v749_v34 = vadd.f32 %v748_v29, %v712_v6 }
  0xf7   :  { %780 = vrot.lane.b32.xlu1 %v749_v34, %s863_s28  ;;  %v753_v63 = vadd.f32 %v752_v4, %v749_v34 }
  0xf9   :  { %v755_v5 = vsel %vm754_vm0, %v753_v63, -inf }
  0xfa   :  { %756 = vmax.xlane.f32.xlu0 %v755_v5 }
 0x169   :  { %v781_v20 = vpop.permute.xlu1 %780 }
 0x16d   :  { %v757_v46 = vpop.xlane.xlu0 %756 }
 0x16e   :  { %v758_v37 = vsub.f32 %v753_v63, %v757_v46 }
 0x170   :  { %v759_v38 = vmul.f32 1.442695, %v758_v37 }
 0x172   :  { %818 = vpow2.f32 %v759_v38 }
 0x178   :  { %v819_v36 = vpop.eup %818 }
 0x179   :  { %v761_v9 = vsel %vm754_vm0, %v819_v36, 0.0 }
 0x17a   :  { %762 = vadd.xlane.f32.xlu0 %v761_v9 }
 0x1ed   :  { %v763_v53 = vpop.xlane.xlu0 %762 }
 0x1ee   :  { %820 = vrcp.f32 %v763_v53  ;;  %v775_v7 = vand.u32 2147483648, %v763_v53  ;;  %v773_v25 = vand.u32 2147483647, %v763_v53  ;;  %vm769_vm2 = vweird.f32 %v763_v53 }
 0x1f0   :  { %v776_v40 = vor.u32 1.1754944e-38, %v775_v7  ;;  %vm774_vm4 = vcmp.eq.f32.partialorder %v773_v25, 8.507059e+37 }
 0x1f4   :  { %v821_v17 = vpop.eup %820 }
 0x1f5   :  { %v765_v3 = vmul.f32 %v821_v17, %v763_v53  ;;  %vm770_vm1 = vweird.f32 %v821_v17 }
 0x1f6   :  { %vm771_vm3 = vmor %vm769_vm2, %vm770_vm1 }
 0x1f7   :  { %v766_v8 = vsub.f32 1.0, %v765_v3 }
 0x1f9   :  { %v767_v52 = vmul.f32 %v821_v17, %v766_v8 }
 0x1fb   :  { %v768_v2 = vadd.f32 %v821_v17, %v767_v52 }
 0x1fd   :  { %v772_v10 = vsel %vm771_vm3, %v821_v17, %v768_v2 }
 0x1fe   :  { %v777_v30 = vsel %vm774_vm4, %v776_v40, %v772_v10 }
 0x1ff   :  { %v778_v28 = vmul.f32 %v819_v36, %v777_v30 }
 0x201   :  { %v783_v60 = vmul.f32 %v781_v20, %v778_v28  ;;  %792 = vst.msk [vmem:[#allocation5] sm:$0x3] %vm754_vm0, %v778_v28 }
 0x202   :  { %805 = dma.vmem_to_hbm [thread:$0]  %s801_s30, 32, %s803_s7, [#allocation3]  }
 0x203   :  { %v784_v35 = vsel %vm754_vm0, %v783_v60, 0.0 }
 0x204   :  { %785 = vadd.xlane.f32.xlu1 %v784_v35 }
 0x277   :  { %v786_v47 = vpop.xlane.xlu1 %785 }
 0x278   :  { %v789_v54 = vadd.f32 %v788_v42, %v786_v47 }
 0x27a   :  { %791 = vst.msk [vmem:[%s1511_s3] sm:$0x3] %vm790_vm5, %v789_v54 }
 0x27b   :  { %860 = dma.done.wait [#allocation3], 32  }
 0x27c   :  { %861 = vsyncadd [#allocation3], 4294967264 }
 0x27d   :  { %812 = vsyncpa [#allocation3], 1 }
 0x27e   :  { %813 = vsyncpa [#allocation4], 1 }

</bundles_post_ra>
